<compile_context>
chip_gen: v7x
topology: tpu7x:2x2x1
jax: 0.10.0
libtpu: 0.0.40
codegen_flags: <defaults>
</compile_context>

<pallas_src>
import jax
import jax.numpy as jnp
from jax.experimental import pallas as pl
from jax.experimental.pallas import tpu as pltpu


def mlp_kernel(x_ref, w1_ref, b1_ref, w2_ref, b2_ref, o_ref):
    # fc1: (TB, IN) @ (IN, HID) on the MXU with f32 accumulation.
    h = jnp.dot(x_ref[...], w1_ref[...], preferred_element_type=jnp.float32)
    h = jnp.maximum(h + b1_ref[...], 0.0)          # bias + relu in f32 (VPU)

    # fc2: downcast the lhs only if the weights are lower precision (bf16 path).
    lhs2 = h if w2_ref.dtype == jnp.float32 else h.astype(w2_ref.dtype)
    out = jnp.dot(lhs2, w2_ref[...], preferred_element_type=jnp.float32)
    out = out + b2_ref[...]
    o_ref[...] = out.astype(o_ref.dtype)


def _cdiv(a: int, b: int) -> int:
    return -(-a // b)


def _round_up(n: int, m: int) -> int:
    return _cdiv(n, m) * m


def simple_mlp(x, w1, b1, w2, b2, *, tb_max=512, compute_dtype=jnp.bfloat16):
    """x: [B, input_size]; w1: [input_size, 64]; b1: [64]; w2: [64, output_size];
    b2: [output_size].

    compute_dtype: dtype of the streamed matmul operands (default bf16 -- the
    kernel is HBM-bound at these shapes, so halving bytes on x/w1/w2 is a
    near-2x win).  Accumulation, bias add and relu are always f32."""
    B, IN = x.shape
    HID = w1.shape[1]
    OUT = w2.shape[1]

    in_dtype = x.dtype
    mm_dtype = jnp.dtype(in_dtype if compute_dtype is None else compute_dtype)
    mm_size = mm_dtype.itemsize
    out_size = jnp.dtype(in_dtype).itemsize

    # Batch/sublane tile: bf16 packs two rows per sublane -> 16-row minimum
    # (avoids packed-row relayout through the XLU); 8 for f32.  TB is chosen to
    # minimise round_up(B, TB) slack, and we force >=2 grid steps when the
    # batch allows it so the "parallel" axis shards across both TCs on v7x.
    sub = 16 if mm_dtype == jnp.dtype(jnp.bfloat16) else 8
    B8 = _round_up(B, sub)
    min_steps = 2 if B8 >= 2 * sub else 1
    n_steps = max(min_steps, _cdiv(B8, tb_max))
    TB = _round_up(_cdiv(B8, n_steps), sub)
    B_P = _round_up(B, TB)

    # Only the batch dim is (cheaply) zero-padded to a TB multiple; feature
    # dims go through unpadded (Mosaic handles MXU-tile padding internally).
    xp = x if (B_P == B and x.dtype == mm_dtype) else (
        jnp.pad(x, ((0, B_P - B), (0, 0))).astype(mm_dtype))
    w1p = w1 if w1.dtype == mm_dtype else w1.astype(mm_dtype)
    w2p = w2 if w2.dtype == mm_dtype else w2.astype(mm_dtype)
    b1p = b1.reshape(1, HID).astype(jnp.float32)
    b2p = b2.reshape(1, OUT).astype(jnp.float32)

    # Accurate (unpadded-dim) cost hint so XLA doesn't over-weight this kernel.
    flops = 2 * B_P * (IN * HID + HID * OUT)
    bytes_accessed = (
        B_P * IN * mm_size            # x
        + IN * HID * mm_size          # w1
        + HID * OUT * mm_size         # w2
        + (HID + OUT) * 4             # biases (f32)
        + B_P * OUT * out_size        # out
    )

    # VMEM guard (v7x: 64 MiB/TC, 32 MiB scoped default; v5e scoped default is
    # 16 MiB).  Conservative estimate: everything double-buffered, dims rounded
    # up to the internal (8/16, 128) tile layout.
    def _lane(n):
        return _round_up(n, 128)

    vmem_needed = 2 * (
        TB * _lane(IN) * mm_size
        + _round_up(IN, sub) * _lane(HID) * mm_size
        + 8 * _lane(HID) * 4
        + _round_up(HID, sub) * _lane(OUT) * mm_size
        + 8 * _lane(OUT) * 4
        + TB * _lane(OUT) * out_size)
    cp_kwargs = {"dimension_semantics": ("parallel",)}
    if vmem_needed > (16 << 20):
        cp_kwargs["vmem_limit_bytes"] = int(min(vmem_needed + (8 << 20), 56 << 20))

    grid = (B_P // TB,)
    out_full = pl.pallas_call(
        mlp_kernel,
        out_shape=jax.ShapeDtypeStruct((B_P, OUT), in_dtype),
        grid=grid,
        in_specs=[
            pl.BlockSpec((TB, IN), lambda i: (i, 0)),    # x tile (pipelined)
            pl.BlockSpec((IN, HID), lambda i: (0, 0)),   # w1 resident
            pl.BlockSpec((1, HID), lambda i: (0, 0)),    # b1 resident
            pl.BlockSpec((HID, OUT), lambda i: (0, 0)),  # w2 resident
            pl.BlockSpec((1, OUT), lambda i: (0, 0)),    # b2 resident
        ],
        out_specs=pl.BlockSpec((TB, OUT), lambda i: (i, 0)),
        compiler_params=pltpu.CompilerParams(**cp_kwargs),
        cost_estimate=pl.CostEstimate(
            flops=flops, bytes_accessed=bytes_accessed, transcendentals=0),
    )(xp, w1p, b1p, w2p, b2p)

    return out_full if B_P == B else out_full[:B]


def init_params(key, input_size, hidden, output_size, dtype=jnp.float32):
    # Deterministic init mimicking nn.Linear's uniform(-1/sqrt(fan_in), +...).
    k1, k2, k3, k4 = jax.random.split(key, 4)
    bound1 = 1.0 / jnp.sqrt(input_size)
    bound2 = 1.0 / jnp.sqrt(hidden)
    w1 = jax.random.uniform(k1, (input_size, hidden), dtype, -bound1, bound1)
    b1 = jax.random.uniform(k2, (hidden,), dtype, -bound1, bound1)
    w2 = jax.random.uniform(k3, (hidden, output_size), dtype, -bound2, bound2)
    b2 = jax.random.uniform(k4, (output_size,), dtype, -bound2, bound2)
    return w1, b1, w2, b2


if __name__ == "__main__":
    input_size, hidden, output_size = 32, 64, 16
    batch = 8

    key = jax.random.PRNGKey(0)
    kx, kp = jax.random.split(key)
    x = jax.random.normal(kx, (batch, input_size), jnp.float32)
    w1, b1, w2, b2 = init_params(kp, input_size, hidden, output_size)

    out_bf16 = simple_mlp(x, w1, b1, w2, b2)                             # default bf16 operands
    out_f32 = simple_mlp(x, w1, b1, w2, b2, compute_dtype=jnp.float32)   # full-precision path
    jax.block_until_ready((out_bf16, out_f32))

    # Reference check in plain JAX (matches the PyTorch forward).
    ref = jnp.maximum(x @ w1 + b1[None, :], 0.0) @ w2 + b2[None, :]
    assert out_bf16.shape == (batch, output_size)
    assert out_f32.shape == (batch, output_size)
    assert jnp.allclose(out_f32, ref, atol=1e-5, rtol=1e-5)
    # bf16 operands with f32 accumulation: loose tolerance per review note.
    assert jnp.allclose(out_bf16, ref, atol=5e-2, rtol=5e-2)

    print("KERNEL_OK")
</pallas_src>

<mosaic_0001>
module attributes {stable_mosaic.version = 11 : i64} {
  func.func @mlp_kernel(%arg0: i32, %arg1: memref<16x32xbf16, #tpu.memory_space<vmem>>, %arg2: memref<32x64xbf16, #tpu.memory_space<vmem>>, %arg3: memref<1x64xf32, #tpu.memory_space<vmem>>, %arg4: memref<64x16xbf16, #tpu.memory_space<vmem>>, %arg5: memref<1x16xf32, #tpu.memory_space<vmem>>, %arg6: memref<16x16xf32, #tpu.memory_space<vmem>>) attributes {dimension_semantics = [#tpu.dimension_semantics<parallel>], iteration_bounds = array<i64: 1>, scalar_prefetch = 0 : i64, scratch_operands = 0 : i64, tpu.core_type = #tpu.core_type<tc>, window_params = [{transform_indices = @transform_0, window_bounds = array<i64: 16, 32>}, {pipeline_mode = #tpu.pipeline_mode<synchronous>, transform_indices = @transform_1, window_bounds = array<i64: 32, 64>}, {pipeline_mode = #tpu.pipeline_mode<synchronous>, transform_indices = @transform_2, window_bounds = array<i64: 1, 64>}, {pipeline_mode = #tpu.pipeline_mode<synchronous>, transform_indices = @transform_3, window_bounds = array<i64: 64, 16>}, {pipeline_mode = #tpu.pipeline_mode<synchronous>, transform_indices = @transform_4, window_bounds = array<i64: 1, 16>}, {transform_indices = @transform_5, window_bounds = array<i64: 16, 16>}]} {
    %c0 = arith.constant 0 : index
    %c0_0 = arith.constant 0 : index
    %0 = vector.load %arg1[%c0, %c0_0] : memref<16x32xbf16, #tpu.memory_space<vmem>>, vector<16x32xbf16>
    %c0_1 = arith.constant 0 : index
    %c0_2 = arith.constant 0 : index
    %1 = vector.load %arg2[%c0_1, %c0_2] : memref<32x64xbf16, #tpu.memory_space<vmem>>, vector<32x64xbf16>
    %cst = arith.constant dense<0.000000e+00> : vector<16x64xf32>
    %2 = tpu.matmul %0, %1, %cst {dimension_numbers = #tpu.dot_dimension_numbers<[1], [0], [0], [1], [0, 0, 1, 1], [], []>} : vector<16x32xbf16>, vector<32x64xbf16>, vector<16x64xf32> -> vector<16x64xf32>
    %c0_3 = arith.constant 0 : index
    %c0_4 = arith.constant 0 : index
    %3 = vector.load %arg3[%c0_3, %c0_4] : memref<1x64xf32, #tpu.memory_space<vmem>>, vector<1x64xf32>
    %4 = vector.broadcast %3 : vector<1x64xf32> to vector<16x64xf32>
    %5 = arith.addf %2, %4 : vector<16x64xf32>
    %cst_5 = arith.constant 0.000000e+00 : f32
    %6 = vector.broadcast %cst_5 : f32 to vector<16x64xf32>
    %7 = arith.maximumf %5, %6 : vector<16x64xf32>
    %8 = arith.truncf %7 : vector<16x64xf32> to vector<16x64xbf16>
    %c0_6 = arith.constant 0 : index
    %c0_7 = arith.constant 0 : index
    %9 = vector.load %arg4[%c0_6, %c0_7] : memref<64x16xbf16, #tpu.memory_space<vmem>>, vector<64x16xbf16>
    %cst_8 = arith.constant dense<0.000000e+00> : vector<16x16xf32>
    %10 = tpu.matmul %8, %9, %cst_8 {dimension_numbers = #tpu.dot_dimension_numbers<[1], [0], [0], [1], [0, 0, 1, 1], [], []>} : vector<16x64xbf16>, vector<64x16xbf16>, vector<16x16xf32> -> vector<16x16xf32>
    %c0_9 = arith.constant 0 : index
    %c0_10 = arith.constant 0 : index
    %11 = vector.load %arg5[%c0_9, %c0_10] : memref<1x16xf32, #tpu.memory_space<vmem>>, vector<1x16xf32>
    %12 = vector.broadcast %11 : vector<1x16xf32> to vector<16x16xf32>
    %13 = arith.addf %10, %12 : vector<16x16xf32>
    %c0_11 = arith.constant 0 : index
    %c0_12 = arith.constant 0 : index
    %14 = vector.load %arg6[%c0_11, %c0_12] : memref<16x16xf32, #tpu.memory_space<vmem>>, vector<16x16xf32>
    tpu.vector_store %arg6[%c0_11, %c0_12], %13 {strides = array<i32>} : memref<16x16xf32, #tpu.memory_space<vmem>>, vector<16x16xf32>,
    return
  }
  func.func @transform_0(%arg0: i32) -> (i32, i32) {
    %c0_i32 = arith.constant 0 : i32
    %c0_i32_0 = arith.constant 0 : i32
    return %arg0, %c0_i32 : i32, i32
  }
  func.func @transform_1(%arg0: i32) -> (i32, i32) {
    %c0_i32 = arith.constant 0 : i32
    %c0_i32_0 = arith.constant 0 : i32
    %c0_i32_1 = arith.constant 0 : i32
    return %c0_i32, %c0_i32_0 : i32, i32
  }
  func.func @transform_2(%arg0: i32) -> (i32, i32) {
    %c0_i32 = arith.constant 0 : i32
    %c0_i32_0 = arith.constant 0 : i32
    %c0_i32_1 = arith.constant 0 : i32
    return %c0_i32, %c0_i32_0 : i32, i32
  }
  func.func @transform_3(%arg0: i32) -> (i32, i32) {
    %c0_i32 = arith.constant 0 : i32
    %c0_i32_0 = arith.constant 0 : i32
    %c0_i32_1 = arith.constant 0 : i32
    return %c0_i32, %c0_i32_0 : i32, i32
  }
  func.func @transform_4(%arg0: i32) -> (i32, i32) {
    %c0_i32 = arith.constant 0 : i32
    %c0_i32_0 = arith.constant 0 : i32
    %c0_i32_1 = arith.constant 0 : i32
    return %c0_i32, %c0_i32_0 : i32, i32
  }
  func.func @transform_5(%arg0: i32) -> (i32, i32) {
    %c0_i32 = arith.constant 0 : i32
    %c0_i32_0 = arith.constant 0 : i32
    return %arg0, %c0_i32 : i32, i32
  }
}

</mosaic_0001>

<bundles_post_ra>
// kernel: tpu_custom_call.1
= control target key start
LH: loop header
LB: loop body
LE: loop exit
PB: predicated region body
PF: predicated region fallthrough
CT: control target
= control target key end

     0   :  { %v278_v1 = vmov 0.0   ;;  %vm279_vm0 = vmmov 0   ;;  %vm52_vm1 = vcmask 261120   ;;  %s352_s0 = inlined_call_operand.vmem [shape: bf16[16,32], index: 0, kind: input, shape index: {}]   ;;  %s353_s1 = inlined_call_operand.vmem [shape: bf16[32,64], index: 1, kind: input, shape index: {}]   ;;  %s354_s2 = inlined_call_operand.vmem [shape: f32[1,64], index: 2, kind: input, shape index: {}]   ;;  %s355_s3 = inlined_call_operand.vmem [shape: bf16[64,16], index: 3, kind: input, shape index: {}]   ;;  %s356_s4 = inlined_call_operand.vmem [shape: f32[1,16], index: 4, kind: input, shape index: {}]   ;;  %s357_s5 = inlined_call_operand.hbm [shape: f32[16,16], index: 5, kind: output, shape index: {}]  }
   0x1   :  { %v247_v0 = vld [vmem:[%s353_s1] sm:$0xff]   ;;  %222 = vmatprep.subr.bf16.mxu0 %v278_v1  ;;  %230 = vmatprep.subr.bf16.mxu1 %v278_v1  ;;  %v248_v2 = vld [vmem:[%s353_s1 + $0x8] sm:$0xff]  }
   0x2   :  { %223 = vmatpush3.bf16.msra.mxu0 %v247_v0  ;;  %226 = vmatprep.mubr.msk.bf16.mxu0 %vm279_vm0, %v278_v1  ;;  %v250_v3 = vld [vmem:[%s355_s3] sm:$0xff]   ;;  %v251_v5 = vld [vmem:[%s355_s3 + $0x8] sm:$0xff]  }
   0x3   :  { %224 = vmatprep.subr.bf16.mxu0 %v278_v1  ;;  %238 = vmatprep.mubr.msk.bf16.mxu1 %vm279_vm0, %v278_v1  ;;  %v249_v4 = vld [vmem:[%s352_s0] sm:$0xff]  }
   0x4   :  { %231 = vmatpush3.bf16.msra.mxu1 %v250_v3 }
   0x5   :  { %232 = vmatprep.subr.bf16.mxu1 %v278_v1 }
   0x6   :  { %225 = vmatpush3.bf16.msra.mxu0 %v248_v2 }
   0x7   :  { %10 = vsyncpa [#allocation3], 0  ;;  %v252_v6 = vld [vmem:[%s355_s3 + $0x10] sm:$0xff]   ;;  %v253_v7 = vld [vmem:[%s355_s3 + $0x18] sm:$0xff]   ;;  %vm139_vm2 = vcmask 523264   ;;  %s280_s3 = smov [#allocation2]  }
   0x8   :  { %233 = vmatpush3.bf16.msra.mxu1 %v251_v5  ;;  %v203_v8 = vld [vmem:[%s354_s2] ss:$0 sm:$0xff]  ;;  %s192_s9 = sshll.u32 %s280_s3, 4  ;;  %vm184_vm3 = vcmask 130048   ;;  %s193_s9 = int_to_ptr.vmem [resolvable:$true] %s192_s9 }
   0x9   :  { %227 = vmatmul.mubr.msk.bf16.vlgmr.msra.gmra.mrb[0].mxu0 %vm52_vm1, %v249_v4  ;;  %234 = vmatprep.subr.bf16.mxu1 %v278_v1  ;;  %v208_v18 = vld [vmem:[%s356_s4] ss:$0 sm:$0xff]  ;;  %s254_s2 = scalar_lea.vmem %s193_s9, 256  ;;  %p259_p1 = scmp.lt.s32.totalorder %s193_s9, %s193_s9 }
   0xa   :  { %p255_p0 = scmp.ne.s32.totalorder %s193_s9, %s254_s2  ;;  %p260_p2 = scmp.lt.s32.totalorder %s254_s2, %s254_s2 }
   0xc   :  { %235 = vmatpush3.bf16.msra.mxu1 %v252_v6  ;;  %p261_p3 = por %p260_p2, %p259_p1 }
   0xd   :  { %236 = vmatprep.subr.bf16.mxu1 %v278_v1 }
   0xe   :  { %p262_p4 = pnand %p261_p3, %p255_p0 }
  0x10   :  { %237 = vmatpush3.bf16.msra.mxu1 %v253_v7 }
  0xdc   :  { %v90_v9 = vpop.f32.mrb[0].mxu0 }
  0xdd   :  { %v91_v10 = vadd.f32 %v203_v8, %v90_v9  ;;  %v228_v11 = vpop.f32.mrb[1].mxu0 }
  0xde   :  { %v93_v12 = vpop.f32.mrb[2].mxu0 }
  0xdf   :  { %v94_v13 = vadd.f32 %v203_v8, %v93_v12  ;;  %v229_v14 = vpop.f32.mrb[3].mxu0  ;;  %v97_v15 = vmax.f32 %v91_v10, 0.0 }
  0xe1   :  { %v98_v16 = vmax.f32 %v94_v13, 0.0 }
  0xe3   :  { %v99_v17 = vpack.c.bf16 %v98_v16, %v97_v15 }
  0xe5   :  { %239 = vmatmul.mubr.msk.bf16.vlgmr.msra.gmra.mrb[0].mxu1 %vm139_vm2, %v99_v17 }
 0x1b8   :  { %v177_v19 = vpop.f32.mrb[0].mxu1 }
 0x1b9   :  { %v178_v20 = vadd.f32 %v208_v18, %v177_v19  ;;  %v240_v21 = vpop.f32.mrb[1].mxu1 }
 0x1ba   :  { %v180_v22 = vpop.f32.mrb[2].mxu1 }
 0x1bb   :  { %185 = vst.msk [vmem:[#allocation2] sm:$0xff] %vm184_vm3, %v178_v20  ;;  %v181_v23 = vadd.f32 %v208_v18, %v180_v22  ;;  %v241_v24 = vpop.f32.mrb[3].mxu1 }
 0x1bd   :  { %186 = vst.msk [vmem:[#allocation2 + $0x8] sm:$0xff] %vm184_vm3, %v181_v23 }
 0x1be   :  { %265 = shalt.err (!%p262_p4)
}
 0x1bf   :  { %s266_s11 = scalar_lea.hbm %s357_s5, 256 }
 0x1c0   :  { %p267_p5 = scmp.ne.s32.totalorder %s357_s5, %s266_s11  ;;  %p270_p6 = scmp.lt.u32.totalorder %s266_s11, %s357_s5 }
 0x1c2   :  { %p272_p7 = pnand %p270_p6, %p267_p5 }
 0x1c4   :  { %275 = shalt.err (!%p272_p7)
}
 0x1c5   :  { %s281_s16 = smov 128   ;;  %s282_s17 = smov 8  }
 0x1c6   :  { %198 = dma.vmem_to_hbm [thread:$0]  %s193_s9, 256, %s357_s5, [#allocation3], %s281_s16, %s281_s16, %s282_s17  }
 0x1c7   :  { %276 = dma.done.wait [#allocation3], 256  }
 0x1c8   :  { %277 = vsyncadd [#allocation3], 4294967040 }
 0x1c9   :  { %202 = vsyncpa [#allocation3], 1 }

</bundles_post_ra>
